<compile_context>
chip_gen: v7x
topology: tpu7x:2x2x1
jax: 0.10.0
libtpu: 0.0.40
codegen_flags: <defaults>
</compile_context>

<pallas_src>
import math

import jax
import jax.numpy as jnp
from jax.experimental import pallas as pl
from jax.experimental.pallas import tpu as pltpu

LANE = 128


def _round_up(x: int, m: int) -> int:
    return ((x + m - 1) // m) * m


def quantile_layer_kernel(tau_ref, pik_ref, w1_ref, b1_ref, alpha_ref,
                          w2_ref, b2_ref, out_ref):
    """One (tm, 1) row-tile: cosine embedding -> Linear -> PReLU -> Linear."""
    tau = tau_ref[...]                                   # (tm, 1) f32

    # Cosine embedding: cos(tau * pi * k), with pi*k precomputed & VMEM-resident.
    cos_emb = jnp.cos(tau * pik_ref[...])                # (tm, D) f32

    # Linear 1 (MXU, bf16 operands, f32 accumulation) + bias + PReLU (VPU, f32).
    h = jnp.dot(cos_emb.astype(jnp.bfloat16), w1_ref[...],
                preferred_element_type=jnp.float32)      # (tm, D) f32
    h = h + b1_ref[...]                                  # (1, D) broadcast
    alpha = alpha_ref[0, 0]                              # scalar from SMEM
    h = jnp.where(h >= 0.0, h, alpha * h)

    # Linear 2 (MXU, bf16 operands, f32 accumulation), lane-dense padded N.
    out = jnp.dot(h.astype(jnp.bfloat16), w2_ref[...],
                  preferred_element_type=jnp.float32)    # (tm, Npad) f32
    out_ref[...] = (out + b2_ref[...]).astype(out_ref.dtype)


def prepare_quantile_params(w1, b1, alpha, w2, b2):
    """One-time parameter preparation (do NOT call per forward step).

    Weights are stored transposed vs. PyTorch: w1 (D, D), w2 (D, N),
    biases (1, D) / (1, N), alpha a scalar.
    """
    D = w1.shape[0]
    N = w2.shape[1]
    n_pad = _round_up(max(N, LANE), LANE)

    w2p = jnp.zeros((D, n_pad), jnp.bfloat16).at[:, :N].set(w2.astype(jnp.bfloat16))
    b2p = jnp.zeros((1, n_pad), jnp.float32).at[:, :N].set(b2.astype(jnp.float32))
    pik = (jnp.arange(D, dtype=jnp.float32) * jnp.float32(math.pi)).reshape(1, D)

    return {
        "d": D,
        "n": N,
        "n_pad": n_pad,
        "pik": pik,                                           # (1, D) f32, pi*arange
        "w1": w1.astype(jnp.bfloat16),                        # (D, D) bf16
        "b1": b1.astype(jnp.float32).reshape(1, D),           # (1, D) f32
        "alpha": jnp.asarray(alpha, jnp.float32).reshape(1, 1),
        "w2": w2p,                                            # (D, Npad) bf16
        "b2": b2p,                                            # (1, Npad) f32
    }


def quantile_layer_apply(params, tau, *, tm=2048, out_dtype=jnp.float32,
                         return_padded=False):
    """tau: (B, Q) f32 -> (B, Q, num_output) in `out_dtype`.

    If return_padded=True, returns the raw (m_pad, n_pad) kernel output (no
    slice copy); useful when the consumer can index the padded slab directly.
    """
    B, Q = tau.shape
    M = B * Q
    D, N, n_pad = params["d"], params["n"], params["n_pad"]
    out_dtype = jnp.dtype(out_dtype)

    # --- row tiling (sublane alignment: 8 rows for 32-bit, 16 for 16-bit out) ---
    row_align = 16 if out_dtype.itemsize < 4 else 8
    tm_eff = min(tm, _round_up(M, row_align))
    tm_eff = _round_up(tm_eff, row_align)
    m_pad = _round_up(M, tm_eff)
    grid = (m_pad // tm_eff,)

    tau_flat = tau.reshape(M, 1).astype(jnp.float32)
    if m_pad != M:
        tau_flat = jnp.zeros((m_pad, 1), jnp.float32).at[:M, :].set(tau_flat)

    cost = pl.CostEstimate(
        flops=2 * m_pad * D * (D + n_pad),
        transcendentals=m_pad * D,
        bytes_accessed=(m_pad * 4                      # tau read
                        + D * 4 + D * D * 2 + D * 4    # pik, W1, b1
                        + D * n_pad * 2 + n_pad * 4    # W2, b2
                        + m_pad * n_pad * out_dtype.itemsize),  # output write
    )

    out_flat = pl.pallas_call(
        quantile_layer_kernel,
        out_shape=jax.ShapeDtypeStruct((m_pad, n_pad), out_dtype),
        grid=grid,
        in_specs=[
            pl.BlockSpec((tm_eff, 1), lambda i: (i, 0)),            # tau tile
            pl.BlockSpec((1, D), lambda i: (0, 0)),                 # pi*k (resident)
            pl.BlockSpec((D, D), lambda i: (0, 0)),                 # W1 (resident)
            pl.BlockSpec((1, D), lambda i: (0, 0)),                 # b1 (resident)
            pl.BlockSpec(memory_space=pltpu.MemorySpace.SMEM),      # alpha scalar
            pl.BlockSpec((D, n_pad), lambda i: (0, 0)),             # W2 (resident)
            pl.BlockSpec((1, n_pad), lambda i: (0, 0)),             # b2 (resident)
        ],
        out_specs=pl.BlockSpec((tm_eff, n_pad), lambda i: (i, 0)),  # lane-dense out
        compiler_params=pltpu.CompilerParams(
            dimension_semantics=("parallel",),
            vmem_limit_bytes=32 * 1024 * 1024,
        ),
        cost_estimate=cost,
    )(tau_flat, params["pik"], params["w1"], params["b1"], params["alpha"],
      params["w2"], params["b2"])

    if return_padded:
        return out_flat
    return out_flat[:M, :N].reshape(B, Q, N)


def quantile_layer(tau, w1, b1, alpha, w2, b2, **kwargs):
    """Convenience one-shot wrapper (prepares params every call)."""
    return quantile_layer_apply(prepare_quantile_params(w1, b1, alpha, w2, b2),
                                tau, **kwargs)


def _reference(tau, w1, b1, alpha, w2, b2):
    """Pure-JAX f32 reference mirroring the PyTorch forward."""
    D = w1.shape[0]
    ints = jnp.arange(D, dtype=jnp.float32)
    cos_emb = jnp.cos(tau[..., None] * ints * jnp.float32(math.pi))
    h = cos_emb @ w1 + b1[0]
    h = jnp.where(h >= 0.0, h, alpha * h)
    return h @ w2 + b2[0]


if __name__ == "__main__":
    # Small deterministic setup consistent with the module.
    B, Q = 2, 8                  # batch of 2, 8 sampled quantiles (tau in [0, 1])
    D = 128                      # cos_embedding_dim
    NUM_OUTPUT = 32

    key = jax.random.PRNGKey(0)
    k_tau, k_w1, k_b1, k_w2, k_b2 = jax.random.split(key, 5)

    tau = jax.random.uniform(k_tau, (B, Q), dtype=jnp.float32)

    # PyTorch nn.Linear default init: U(-1/sqrt(fan_in), 1/sqrt(fan_in)).
    bound = 1.0 / math.sqrt(D)
    w1 = jax.random.uniform(k_w1, (D, D), jnp.float32, -bound, bound)       # (in, out)
    b1 = jax.random.uniform(k_b1, (1, D), jnp.float32, -bound, bound)
    w2 = jax.random.uniform(k_w2, (D, NUM_OUTPUT), jnp.float32, -bound, bound)
    b2 = jax.random.uniform(k_b2, (1, NUM_OUTPUT), jnp.float32, -bound, bound)
    alpha = jnp.float32(0.25)    # PReLU default single shared parameter

    params = prepare_quantile_params(w1, b1, alpha, w2, b2)
    ref = _reference(tau, w1, b1, alpha, w2, b2)

    # 1) Default path: f32 output, single grid step.
    out = jax.block_until_ready(quantile_layer_apply(params, tau))
    assert out.shape == (B, Q, NUM_OUTPUT), out.shape
    assert jnp.allclose(out, ref, atol=5e-2, rtol=5e-2), \
        float(jnp.max(jnp.abs(out - ref)))

    # 2) Multi-grid-step path: tiny tile forces M > tm (2 grid steps).
    out_ms = jax.block_until_ready(quantile_layer_apply(params, tau, tm=8))
    assert out_ms.shape == (B, Q, NUM_OUTPUT), out_ms.shape
    assert jnp.allclose(out_ms, ref, atol=5e-2, rtol=5e-2), \
        float(jnp.max(jnp.abs(out_ms - ref)))

    # 3) bf16-output path (halves output HBM writeback for downstream that accepts it).
    out_bf = jax.block_until_ready(
        quantile_layer_apply(params, tau, out_dtype=jnp.bfloat16))
    assert out_bf.dtype == jnp.bfloat16 and out_bf.shape == (B, Q, NUM_OUTPUT)
    assert jnp.allclose(out_bf.astype(jnp.float32), ref, atol=5e-2, rtol=5e-2), \
        float(jnp.max(jnp.abs(out_bf.astype(jnp.float32) - ref)))

    print("KERNEL_OK")
</pallas_src>

<mosaic_0001>
module attributes {stable_mosaic.version = 11 : i64} {
  func.func @quantile_layer_kernel(%arg0: i32, %arg1: memref<16x1xf32, #tpu.memory_space<vmem>>, %arg2: memref<1x128xf32, #tpu.memory_space<vmem>>, %arg3: memref<128x128xbf16, #tpu.memory_space<vmem>>, %arg4: memref<1x128xf32, #tpu.memory_space<vmem>>, %arg5: memref<1x1xf32, #tpu.memory_space<smem>>, %arg6: memref<128x128xbf16, #tpu.memory_space<vmem>>, %arg7: memref<1x128xf32, #tpu.memory_space<vmem>>, %arg8: memref<16x128xf32, #tpu.memory_space<vmem>>) attributes {dimension_semantics = [#tpu.dimension_semantics<parallel>], iteration_bounds = array<i64: 1>, scalar_prefetch = 0 : i64, scratch_operands = 0 : i64, tpu.core_type = #tpu.core_type<tc>, window_params = [{transform_indices = @transform_0, window_bounds = array<i64: 16, 1>}, {pipeline_mode = #tpu.pipeline_mode<synchronous>, transform_indices = @transform_1, window_bounds = array<i64: 1, 128>}, {pipeline_mode = #tpu.pipeline_mode<synchronous>, transform_indices = @transform_2, window_bounds = array<i64: 128, 128>}, {pipeline_mode = #tpu.pipeline_mode<synchronous>, transform_indices = @transform_3, window_bounds = array<i64: 1, 128>}, {transform_indices = @transform_4, window_bounds = array<i64: 1, 1>}, {pipeline_mode = #tpu.pipeline_mode<synchronous>, transform_indices = @transform_5, window_bounds = array<i64: 128, 128>}, {pipeline_mode = #tpu.pipeline_mode<synchronous>, transform_indices = @transform_6, window_bounds = array<i64: 1, 128>}, {transform_indices = @transform_7, window_bounds = array<i64: 16, 128>}]} {
    %c0 = arith.constant 0 : index
    %c0_0 = arith.constant 0 : index
    %0 = vector.load %arg1[%c0, %c0_0] : memref<16x1xf32, #tpu.memory_space<vmem>>, vector<16x1xf32>
    %c0_1 = arith.constant 0 : index
    %c0_2 = arith.constant 0 : index
    %1 = vector.load %arg2[%c0_1, %c0_2] : memref<1x128xf32, #tpu.memory_space<vmem>>, vector<1x128xf32>
    %2 = vector.broadcast %0 : vector<16x1xf32> to vector<16x128xf32>
    %3 = vector.broadcast %1 : vector<1x128xf32> to vector<16x128xf32>
    %4 = arith.mulf %2, %3 : vector<16x128xf32>
    %5 = math.cos %4 : vector<16x128xf32>
    %6 = arith.truncf %5 : vector<16x128xf32> to vector<16x128xbf16>
    %c0_3 = arith.constant 0 : index
    %c0_4 = arith.constant 0 : index
    %7 = vector.load %arg3[%c0_3, %c0_4] : memref<128x128xbf16, #tpu.memory_space<vmem>>, vector<128x128xbf16>
    %cst = arith.constant dense<0.000000e+00> : vector<16x128xf32>
    %8 = tpu.matmul %6, %7, %cst {dimension_numbers = #tpu.dot_dimension_numbers<[1], [0], [0], [1], [0, 0, 1, 1], [], []>} : vector<16x128xbf16>, vector<128x128xbf16>, vector<16x128xf32> -> vector<16x128xf32>
    %c0_5 = arith.constant 0 : index
    %c0_6 = arith.constant 0 : index
    %9 = vector.load %arg4[%c0_5, %c0_6] : memref<1x128xf32, #tpu.memory_space<vmem>>, vector<1x128xf32>
    %10 = vector.broadcast %9 : vector<1x128xf32> to vector<16x128xf32>
    %11 = arith.addf %8, %10 : vector<16x128xf32>
    %c0_7 = arith.constant 0 : index
    %c0_8 = arith.constant 0 : index
    %12 = memref.load %arg5[%c0_7, %c0_8] : memref<1x1xf32, #tpu.memory_space<smem>>
    %cst_9 = arith.constant 0.000000e+00 : f32
    %13 = vector.broadcast %cst_9 : f32 to vector<16x128xf32>
    %14 = arith.cmpf oge, %11, %13 : vector<16x128xf32>
    %15 = vector.broadcast %12 : f32 to vector<16x128xf32>
    %16 = arith.mulf %15, %11 : vector<16x128xf32>
    %17 = arith.select %14, %11, %16 : vector<16x128xi1>, vector<16x128xf32>
    %18 = arith.truncf %17 : vector<16x128xf32> to vector<16x128xbf16>
    %c0_10 = arith.constant 0 : index
    %c0_11 = arith.constant 0 : index
    %19 = vector.load %arg6[%c0_10, %c0_11] : memref<128x128xbf16, #tpu.memory_space<vmem>>, vector<128x128xbf16>
    %cst_12 = arith.constant dense<0.000000e+00> : vector<16x128xf32>
    %20 = tpu.matmul %18, %19, %cst_12 {dimension_numbers = #tpu.dot_dimension_numbers<[1], [0], [0], [1], [0, 0, 1, 1], [], []>} : vector<16x128xbf16>, vector<128x128xbf16>, vector<16x128xf32> -> vector<16x128xf32>
    %c0_13 = arith.constant 0 : index
    %c0_14 = arith.constant 0 : index
    %21 = vector.load %arg7[%c0_13, %c0_14] : memref<1x128xf32, #tpu.memory_space<vmem>>, vector<1x128xf32>
    %22 = vector.broadcast %21 : vector<1x128xf32> to vector<16x128xf32>
    %23 = arith.addf %20, %22 : vector<16x128xf32>
    %c0_15 = arith.constant 0 : index
    %c0_16 = arith.constant 0 : index
    %24 = vector.load %arg8[%c0_15, %c0_16] : memref<16x128xf32, #tpu.memory_space<vmem>>, vector<16x128xf32>
    tpu.vector_store %arg8[%c0_15, %c0_16], %23 {strides = array<i32>} : memref<16x128xf32, #tpu.memory_space<vmem>>, vector<16x128xf32>,
    return
  }
  func.func @transform_0(%arg0: i32) -> (i32, i32) {
    %c0_i32 = arith.constant 0 : i32
    %c0_i32_0 = arith.constant 0 : i32
    return %arg0, %c0_i32 : i32, i32
  }
  func.func @transform_1(%arg0: i32) -> (i32, i32) {
    %c0_i32 = arith.constant 0 : i32
    %c0_i32_0 = arith.constant 0 : i32
    %c0_i32_1 = arith.constant 0 : i32
    return %c0_i32, %c0_i32_0 : i32, i32
  }
  func.func @transform_2(%arg0: i32) -> (i32, i32) {
    %c0_i32 = arith.constant 0 : i32
    %c0_i32_0 = arith.constant 0 : i32
    %c0_i32_1 = arith.constant 0 : i32
    return %c0_i32, %c0_i32_0 : i32, i32
  }
  func.func @transform_3(%arg0: i32) -> (i32, i32) {
    %c0_i32 = arith.constant 0 : i32
    %c0_i32_0 = arith.constant 0 : i32
    %c0_i32_1 = arith.constant 0 : i32
    return %c0_i32, %c0_i32_0 : i32, i32
  }
  func.func @transform_4(%arg0: i32) -> (i32, i32) {
    %c0_i32 = arith.constant 0 : i32
    %c0_i32_0 = arith.constant 0 : i32
    %c0_i32_1 = arith.constant 0 : i32
    return %c0_i32, %c0_i32_0 : i32, i32
  }
  func.func @transform_5(%arg0: i32) -> (i32, i32) {
    %c0_i32 = arith.constant 0 : i32
    %c0_i32_0 = arith.constant 0 : i32
    %c0_i32_1 = arith.constant 0 : i32
    return %c0_i32, %c0_i32_0 : i32, i32
  }
  func.func @transform_6(%arg0: i32) -> (i32, i32) {
    %c0_i32 = arith.constant 0 : i32
    %c0_i32_0 = arith.constant 0 : i32
    %c0_i32_1 = arith.constant 0 : i32
    return %c0_i32, %c0_i32_0 : i32, i32
  }
  func.func @transform_7(%arg0: i32) -> (i32, i32) {
    %c0_i32 = arith.constant 0 : i32
    %c0_i32_0 = arith.constant 0 : i32
    return %arg0, %c0_i32 : i32, i32
  }
}

</mosaic_0001>

<bundles_post_ra>
// kernel: tpu_custom_call.1
= control target key start
LH: loop header
LB: loop body
LE: loop exit
PB: predicated region body
PF: predicated region fallthrough
CT: control target
= control target key end

     0   :  { %13 = vsyncpa [#allocation4], 0  ;;  %s949_s0 = inlined_call_operand.vmem [shape: f32[16,1], index: 0, kind: input, shape index: {}]   ;;  %s950_s1 = inlined_call_operand.vmem [shape: f32[1,128], index: 1, kind: input, shape index: {}]   ;;  %s951_s2 = inlined_call_operand.hbm [shape: bf16[128,128], index: 2, kind: input, shape index: {}]   ;;  %s952_s3 = inlined_call_operand.vmem [shape: f32[1,128], index: 3, kind: input, shape index: {}]   ;;  %s953_s4 = inlined_call_operand.<no memory space> [shape: f32[1,1], index: 4, kind: input, shape index: {}]   ;;  %s954_s5 = inlined_call_operand.hbm [shape: bf16[128,128], index: 5, kind: input, shape index: {}]   ;;  %s955_s6 = inlined_call_operand.vmem [shape: f32[1,128], index: 6, kind: input, shape index: {}]   ;;  %s956_s7 = inlined_call_operand.hbm [shape: f32[16,128], index: 7, kind: output, shape index: {}]  }
   0x1   :  { %14 = vsyncpa [#allocation7], 0 }
   0x2   :  { %15 = vsyncpa [#allocation5], 0  ;;  %s744_s24 = smov [#allocation3]   ;;  %s672_s28 = scalar_lea.hbm %s951_s2, 1024 }
   0x3   :  { %s25_s25 = sshll.u32 %s744_s24, 4  ;;  %p673_p0 = scmp.ne.s32.totalorder %s951_s2, %s672_s28  ;;  %s26_s25 = int_to_ptr.vmem [resolvable:$true] %s25_s25 }
   0x4   :  { %p676_p1 = scmp.lt.u32.totalorder %s672_s28, %s951_s2 }
   0x6   :  { %p678_p2 = pnand %p676_p1, %p673_p0 }
   0x8   :  { %681 = shalt.err (!%p678_p2)
}
   0x9   :  { %s682_s10 = scalar_lea.vmem %s26_s25, 1024  ;;  %p687_p4 = scmp.lt.s32.totalorder %s26_s25, %s26_s25 }
   0xa   :  { %p683_p3 = scmp.ne.s32.totalorder %s26_s25, %s682_s10  ;;  %p688_p5 = scmp.lt.s32.totalorder %s682_s10, %s682_s10 }
   0xc   :  { %p689_p6 = por %p688_p5, %p687_p4 }
   0xe   :  { %p690_p7 = pnand %p689_p6, %p683_p3 }
  0x10   :  { %693 = shalt.err (!%p690_p7)
}
  0x11   :  { %s745_s11 = smov 64   ;;  %s746_s12 = smov 4  }
  0x12   :  { %31 = dma.hbm_to_vmem [thread:$0]  %s951_s2, 1024, %s26_s25, [#allocation4], %s745_s11, %s745_s11, %s746_s12  }
  0x13   :  { %s747_s15 = smov [#allocation6]   ;;  %s694_s19 = scalar_lea.hbm %s954_s5, 1024 }
  0x14   :  { %s41_s16 = sshll.u32 %s747_s15, 4  ;;  %p695_p8 = scmp.ne.s32.totalorder %s954_s5, %s694_s19  ;;  %s42_s16 = int_to_ptr.vmem [resolvable:$true] %s41_s16 }
  0x15   :  { %p698_p9 = scmp.lt.u32.totalorder %s694_s19, %s954_s5 }
  0x17   :  { %p700_p10 = pnand %p698_p9, %p695_p8 }
  0x19   :  { %703 = shalt.err (!%p700_p10)
}
  0x1a   :  { %s704_s24 = scalar_lea.vmem %s42_s16, 1024  ;;  %p709_p12 = scmp.lt.s32.totalorder %s42_s16, %s42_s16 }
  0x1b   :  { %p705_p11 = scmp.ne.s32.totalorder %s42_s16, %s704_s24  ;;  %p710_p13 = scmp.lt.s32.totalorder %s704_s24, %s704_s24 }
  0x1d   :  { %p711_p0 = por %p710_p13, %p709_p12 }
  0x1f   :  { %p712_p1 = pnand %p711_p0, %p705_p11 }
  0x21   :  { %715 = shalt.err (!%p712_p1)
}
  0x22   :  { %47 = dma.hbm_to_vmem [thread:$0]  %s954_s5, 1024, %s42_s16, [#allocation7], %s745_s11, %s745_s11, %s746_s12  }
  0x23   :  { %738 = dma.done.wait [#allocation4], 1024  }
  0x24   :  { %739 = vsyncadd [#allocation4], 4294966272 }
  0x25   :  { %740 = dma.done.wait [#allocation7], 1024  }
  0x26   :  { %741 = vsyncadd [#allocation7], 4294966272  ;;  %v748_v0 = vmov 0   ;;  %v57_v1 = vld [vmem:[%s949_s0] sm:$0xff]  ;;  %v58_v2 = vld [vmem:[%s949_s0 + $0x8] sm:$0xff]  ;;  %v749_v4 = vmov 0.0  }
  0x27   :  { %647 = vset.pattern.permute.xlu0 %v748_v0  ;;  %v648_v3 = vld [vmem:[#allocation3] sm:$0xff]   ;;  %583 = vmatprep.subr.bf16.mxu0 %v749_v4  ;;  %v649_v5 = vld [vmem:[#allocation3 + $0x8] sm:$0xff]   ;;  %v650_v6 = vld [vmem:[#allocation3 + $0x10] sm:$0xff]   ;;  %vm750_vm0 = vmmov 0   ;;  %v751_v39 = vmov 683565275  }
  0x28   :  { %62 = vperm.xlu0 %647, %v57_v1   ;;  %603 = vmatprep.subr.bf16.mxu1 %v749_v4  ;;  %v651_v7 = vld [vmem:[#allocation3 + $0x18] sm:$0xff]   ;;  %v652_v8 = vld [vmem:[#allocation3 + $0x20] sm:$0xff]   ;;  %v653_v9 = vld [vmem:[#allocation3 + $0x28] sm:$0xff]   ;;  %v752_v43 = vmov 2475754826   ;;  %s757_s11 = smov [#allocation8]  }
  0x29   :  { %584 = vmatpush3.bf16.msra.mxu0 %v648_v3  ;;  %599 = vmatprep.mubr.msk.bf16.mxu0 %vm750_vm0, %v749_v4  ;;  %v654_v10 = vld [vmem:[#allocation3 + $0x30] sm:$0xff]   ;;  %v655_v11 = vld [vmem:[#allocation3 + $0x38] sm:$0xff]   ;;  %v656_v12 = vld [vmem:[#allocation6] sm:$0xff]   ;;  %v753_v45 = vmov 2131351028  }
  0x2a   :  { %585 = vmatprep.subr.bf16.mxu0 %v749_v4  ;;  %619 = vmatprep.mubr.msk.bf16.mxu1 %vm750_vm0, %v749_v4  ;;  %v657_v13 = vld [vmem:[#allocation6 + $0x8] sm:$0xff]   ;;  %v658_v14 = vld [vmem:[#allocation6 + $0x10] sm:$0xff]   ;;  %v659_v15 = vld [vmem:[#allocation6 + $0x18] sm:$0xff]   ;;  %v754_v47 = vmov 2102212464  }
  0x2b   :  { %604 = vmatpush3.bf16.msra.mxu1 %v656_v12  ;;  %v660_v16 = vld [vmem:[#allocation6 + $0x20] sm:$0xff]   ;;  %v661_v17 = vld [vmem:[#allocation6 + $0x28] sm:$0xff]   ;;  %v755_v49 = vmov 920167782   ;;  %v756_v56 = vmov 1326507024  }
  0x2c   :  { %67 = vperm.xlu0 %647, %v58_v2   ;;  %605 = vmatprep.subr.bf16.mxu1 %v749_v4  ;;  %v538_v18 = vld [vmem:[%s950_s1] ss:$0 sm:$0xff] }
  0x2d   :  { %586 = vmatpush3.bf16.msra.mxu0 %v649_v5 }
  0x2e   :  { %587 = vmatprep.subr.bf16.mxu0 %v749_v4 }
  0x2f   :  { %606 = vmatpush3.bf16.msra.mxu1 %v657_v13 }
  0x30   :  { %607 = vmatprep.subr.bf16.mxu1 %v749_v4 }
  0x31   :  { %588 = vmatpush3.bf16.msra.mxu0 %v650_v6 }
  0x32   :  { %589 = vmatprep.subr.bf16.mxu0 %v749_v4 }
  0x33   :  { %608 = vmatpush3.bf16.msra.mxu1 %v658_v14 }
  0x34   :  { %609 = vmatprep.subr.bf16.mxu1 %v749_v4 }
  0x35   :  { %590 = vmatpush3.bf16.msra.mxu0 %v651_v7 }
  0x36   :  { %591 = vmatprep.subr.bf16.mxu0 %v749_v4 }
  0x37   :  { %610 = vmatpush3.bf16.msra.mxu1 %v659_v15 }
  0x38   :  { %611 = vmatprep.subr.bf16.mxu1 %v749_v4 }
  0x39   :  { %592 = vmatpush3.bf16.msra.mxu0 %v652_v8 }
  0x3a   :  { %593 = vmatprep.subr.bf16.mxu0 %v749_v4 }
  0x3b   :  { %612 = vmatpush3.bf16.msra.mxu1 %v660_v16 }
  0x3c   :  { %613 = vmatprep.subr.bf16.mxu1 %v749_v4 }
  0x3d   :  { %594 = vmatpush3.bf16.msra.mxu0 %v653_v9 }
  0x3e   :  { %595 = vmatprep.subr.bf16.mxu0 %v749_v4 }
  0x3f   :  { %614 = vmatpush3.bf16.msra.mxu1 %v661_v17 }
  0x40   :  { %615 = vmatprep.subr.bf16.mxu1 %v749_v4 }
  0x41   :  { %596 = vmatpush3.bf16.msra.mxu0 %v654_v10 }
  0x42   :  { %597 = vmatprep.subr.bf16.mxu0 %v749_v4 }
  0x45   :  { %598 = vmatpush3.bf16.msra.mxu0 %v655_v11 }
  0xa7   :  { %v63_v19 = vpop.permute.xlu0 %62 }
  0xa8   :  { %v850_v20 = vmul.f32 %v538_v18, %v63_v19 }
  0xaa   :  { %v78_v21 = vand.u32 2147483647, %v850_v20  ;;  %v81_v22 = vand.u32 2139095040, %v850_v20  ;;  %vm80_vm15 = vcmp.lt.s32.totalorder %v850_v20, 0 }
  0xab   :  { %v68_v23 = vpop.permute.xlu0 %67 }
  0xac   :  { %v82_v24 = vshrl.u32 %v81_v22, 23  ;;  %v854_v25 = vmul.f32 %v538_v18, %v68_v23  ;;  %v85_v26 = vand.u32 8388607, %v78_v21  ;;  %vm908_vm0 = vcmp.le.f32.partialorder %v78_v21, 0.7853982 }
  0xae   :  { %v539_v27 = vadd.s32 4294967169, %v82_v24  ;;  %v184_v28 = vand.u32 2139095040, %v854_v25  ;;  %v86_v30 = vor.u32 8388608, %v85_v26  ;;  %v181_v32 = vand.u32 2147483647, %v854_v25 }
  0xb0   :  { %v88_v29 = vadd.s32 1, %v539_v27  ;;  %v185_v31 = vshrl.u32 %v184_v28, 23  ;;  %v860_v37 = vshll.u32 %v86_v30, 8  ;;  %v188_v41 = vand.u32 8388607, %v181_v32 }
  0xb2   :  { %vm89_vm1 = vcmp.gt.s32.totalorder %v88_v29, 0  ;;  %v543_v34 = vadd.s32 4294967169, %v185_v31  ;;  %v189_v8 = vor.u32 8388608, %v188_v41 }
  0xb3   :  { %v90_v33 = vsel %vm89_vm1, %v88_v29, 0  ;;  %vm183_vm1 = vcmp.lt.s32.totalorder %v854_v25, 0 }
  0xb4   :  { %v91_v35 = vshrl.u32 %v90_v33, 5  ;;  %v92_v36 = vand.u32 31, %v90_v33  ;;  %v191_v42 = vadd.s32 1, %v543_v34  ;;  %v229_v23 = vshll.u32 %v189_v8, 8 }
  0xb6   :  { %v93_v38 = vsub.s32 32, %v92_v36  ;;  %v95_v40 = vshll.u32 %v751_v39, %v92_v36  ;;  %v98_v44 = vshll.u32 %v752_v43, %v92_v36  ;;  %v101_v46 = vshll.u32 %v753_v45, %v92_v36 }
  0xb7   :  { %v104_v48 = vshll.u32 %v754_v47, %v92_v36  ;;  %v107_v50 = vshll.u32 %v755_v49, %v92_v36  ;;  %vm110_vm2 = vcmp.lt.s32.totalorder %v91_v35, 1  ;;  %vm112_vm3 = vcmp.lt.s32.totalorder %v91_v35, 3 }
  0xb8   :  { %v96_v51 = vshrl.u32 %v752_v43, %v93_v38  ;;  %v99_v52 = vshrl.u32 %v753_v45, %v93_v38  ;;  %v102_v53 = vshrl.u32 %v754_v47, %v93_v38  ;;  %v94_v54 = vshrl.u32 %v751_v39, %v93_v38 }
  0xb9   :  { %v105_v55 = vshrl.u32 %v755_v49, %v93_v38  ;;  %v108_v57 = vshrl.u32 %v756_v56, %v93_v38  ;;  %vm192_vm4 = vcmp.gt.s32.totalorder %v191_v42, 0  ;;  %vm113_vm5 = vcmp.lt.s32.totalorder %v91_v35, 4 }
  0xba   :  { %v97_v58 = vor.u32 %v96_v51, %v95_v40  ;;  %v100_v59 = vor.u32 %v99_v52, %v98_v44  ;;  %v103_v60 = vor.u32 %v102_v53, %v101_v46  ;;  %v193_v63 = vsel %vm192_vm4, %v191_v42, 0 }
  0xbb   :  { %v106_v61 = vor.u32 %v105_v55, %v104_v48  ;;  %v109_v62 = vor.u32 %v108_v57, %v107_v50  ;;  %vm111_vm6 = vcmp.lt.s32.totalorder %v91_v35, 2  ;;  %v195_v11 = vand.u32 31, %v193_v63 }
  0xbc   :  { %v114_v0 = vsel %vm110_vm2, %v94_v54, %v97_v58  ;;  %v115_v1 = vsel %vm113_vm5, %v103_v60, 2102212464  ;;  %v118_v2 = vsel %vm110_vm2, %v97_v58, %v100_v59  ;;  %v122_v3 = vsel %vm110_vm2, %v100_v59, %v103_v60 }
  0xbd   :  { %v116_v5 = vsel %vm112_vm3, %v100_v59, %v115_v1  ;;  %v119_v6 = vsel %vm113_vm5, %v106_v61, 920167782  ;;  %v123_v7 = vsel %vm113_vm5, %v109_v62, 1326507024  ;;  %v194_v19 = vshrl.u32 %v193_v63, 5 }
  0xbe   :  { %v120_v9 = vsel %vm112_vm3, %v103_v60, %v119_v6  ;;  %v124_v10 = vsel %vm112_vm3, %v106_v61, %v123_v7  ;;  %v117_v12 = vsel %vm111_vm6, %v114_v0, %v116_v5  ;;  %v196_v22 = vsub.s32 32, %v195_v11 }
  0xbf   :  { %v121_v13 = vsel %vm111_vm6, %v118_v2, %v120_v9  ;;  %v125_v14 = vsel %vm111_vm6, %v122_v3, %v124_v10  ;;  %v133_v24 = vmul.u32 %v860_v37, %v117_v12  ;;  %v198_v26 = vshll.u32 %v751_v39, %v195_v11 }
  0xc0   :  { %v873_v15 = vmul.u32.u64.low %v860_v37, %v125_v14  ;;  %v874_v16 = vmul.u32.u64.high %v860_v37, %v125_v14, %v873_v15  ;;  %v877_v17 = vmul.u32.u64.low %v860_v37, %v121_v13  ;;  %v878_v18 = vmul.u32.u64.high %v860_v37, %v121_v13, %v877_v17 }
  0xc1   :  { %v201_v27 = vshll.u32 %v752_v43, %v195_v11  ;;  %v204_v28 = vshll.u32 %v753_v45, %v195_v11  ;;  %v199_v29 = vshrl.u32 %v752_v43, %v196_v22  ;;  %v202_v30 = vshrl.u32 %v753_v45, %v196_v22 }
  0xc2   :  { %v205_v31 = vshrl.u32 %v754_v47, %v196_v22  ;;  %v207_v33 = vshll.u32 %v754_v47, %v195_v11  ;;  %vm135_vm7 = vc.u32 %v874_v16, %v877_v17  ;;  %v136_v34 = vadd.s32 1, %v878_v18 }
  0xc3   :  { %v208_v35 = vshrl.u32 %v755_v49, %v196_v22  ;;  %v210_v36 = vshll.u32 %v755_v49, %v195_v11  ;;  %v200_v38 = vor.u32 %v199_v29, %v198_v26  ;;  %v203_v40 = vor.u32 %v202_v30, %v201_v27 }
  0xc4   :  { %v206_v41 = vor.u32 %v205_v31, %v204_v28  ;;  %v211_v42 = vshrl.u32 %v756_v56, %v196_v22  ;;  %v137_v37 = vsel %vm135_vm7, %v136_v34, %v878_v18  ;;  %vm213_vm8 = vcmp.lt.s32.totalorder %v194_v19, 1 }
  0xc5   :  { %v209_v44 = vor.u32 %v208_v35, %v207_v33  ;;  %vm216_vm9 = vcmp.lt.s32.totalorder %v194_v19, 4  ;;  %v138_v43 = vadd.s32 %v137_v37, %v133_v24  ;;  %vm215_vm10 = vcmp.lt.s32.totalorder %v194_v19, 3 }
  0xc6   :  { %v212_v45 = vor.u32 %v211_v42, %v210_v36  ;;  %v218_v46 = vsel %vm216_vm9, %v206_v41, 2102212464  ;;  %v197_v47 = vshrl.u32 %v751_v39, %v196_v22  ;;  %v221_v48 = vsel %vm213_vm8, %v200_v38, %v203_v40 }
  0xc7   :  { %v222_v50 = vsel %vm216_vm9, %v209_v44, 920167782  ;;  %v225_v51 = vsel %vm213_vm8, %v203_v40, %v206_v41  ;;  %v139_v52 = vadd.s32 536870912, %v138_v43  ;;  %vm214_vm11 = vcmp.lt.s32.totalorder %v194_v19, 2 }
  0xc8   :  { %v223_v49 = vsel %vm215_vm10, %v206_v41, %v222_v50  ;;  %v226_v53 = vsel %vm216_vm9, %v212_v45, 1326507024  ;;  %v217_v54 = vsel %vm213_vm8, %v197_v47, %v200_v38  ;;  %v219_v55 = vsel %vm215_vm10, %v203_v40, %v218_v46 }
  0xc9   :  { %v224_v56 = vsel %vm214_vm11, %v221_v48, %v223_v49  ;;  %v227_v57 = vsel %vm215_vm10, %v209_v44, %v226_v53  ;;  %v888_v58 = vshrl.u32 %v139_v52, 30  ;;  %v220_v0 = vsel %vm214_vm11, %v217_v54, %v219_v55 }
  0xca   :  { %v228_v59 = vsel %vm214_vm11, %v225_v51, %v227_v57  ;;  %v890_v60 = vmul.u32.u64.low %v229_v23, %v224_v56  ;;  %v891_v61 = vmul.u32.u64.high %v229_v23, %v224_v56, %v890_v60  ;;  %v236_v3 = vmul.u32 %v229_v23, %v220_v0 }
  0xcb   :  { %v893_v62 = vmul.u32.u64.low %v229_v23, %v228_v59  ;;  %v894_v63 = vmul.u32.u64.high %v229_v23, %v228_v59, %v893_v62  ;;  %v141_v39 = vshll.u32 %v888_v58, 30  ;;  %v134_v18 = vadd.s32 %v877_v17, %v874_v16 }
  0xcc   :  { %v239_v2 = vadd.s32 1, %v891_v61  ;;  %v164_v54 = vsub.s32 4, %v888_v58  ;;  %vm182_vm2 = vcmp.le.f32.partialorder %v181_v32, 0.7853982  ;;  %vm170_vm9 = vweird.f32 %v850_v20 }
  0xcd   :  { %v142_v1 = vsub.s32 %v138_v43, %v141_v39  ;;  %vm238_vm12 = vc.u32 %v894_v63, %v890_v60  ;;  %v237_v41 = vadd.s32 %v890_v60, %v894_v63  ;;  %vm273_vm10 = vweird.f32 %v854_v25 }
  0xce   :  { %v240_v6 = vsel %vm238_vm12, %v239_v2, %v891_v61  ;;  %v165_v59 = vsel %vm80_vm15, %v164_v54, %v888_v58 }
  0xcf   :  { %v144_v5 = vsub.s32 0, %v142_v1  ;;  %v241_v7 = vadd.s32 %v240_v6, %v236_v3  ;;  %v167_v61 = vsel %vm908_vm0, 0, %v165_v59 }
  0xd0   :  { %v171_v39 = vand.u32 3, %v167_v61 }
  0xd1   :  { %v540_v8 = vmin.u32 %v144_v5, %v142_v1  ;;  %v242_v9 = vadd.s32 536870912, %v241_v7 }
  0xd2   :  { %vm173_vm3 = vcmp.eq.s32.totalorder %v171_v39, 0  ;;  %vm176_vm4 = vcmp.eq.s32.totalorder %v171_v39, 2  ;;  %vm172_vm5 = vcmp.lt.s32.totalorder %v171_v39, 2 }
  0xd3   :  { %v146_v10 = vclz %v540_v8  ;;  %v243_v11 = vshrl.u32 %v242_v9, 30 }
  0xd5   :  { %v541_v12 = vadd.s32 4294967294, %v146_v10  ;;  %v244_v13 = vshll.u32 %v243_v11, 30  ;;  %v267_v56 = vsub.s32 4, %v243_v11 }
  0xd7   :  { %vm542_vm13 = vcmp.lt.s32.totalorder %v541_v12, 0  ;;  %v245_v15 = vsub.s32 %v241_v7, %v244_v13  ;;  %v268_v62 = vsel %vm183_vm1, %v267_v56, %v243_v11 }
  0xd8   :  { %v149_v14 = vsel %vm542_vm13, 0, %v541_v12  ;;  %v270_v0 = vsel %vm182_vm2, 0, %v268_v62 }
  0xd9   :  { %v150_v19 = vsub.s32 32, %v149_v14  ;;  %v154_v22 = vsub.s32 4294967266, %v149_v14  ;;  %v247_v23 = vsub.s32 0, %v245_v15  ;;  %v151_v24 = vshll.u32 %v142_v1, %v149_v14 }
  0xda   :  { %v274_v2 = vand.u32 3, %v270_v0 }
  0xdb   :  { %v152_v26 = vshrl.u32 %v134_v18, %v150_v19  ;;  %v155_v27 = vadd.s32 127, %v154_v22  ;;  %v544_v28 = vmin.u32 %v247_v23, %v245_v15  ;;  %v662_v18 = vld [vmem:[#allocation6 + $0x30] sm:$0xff]   ;;  %v663_v19 = vld [vmem:[#allocation6 + $0x38] sm:$0xff]   ;;  %v547_v22 = vld [vmem:[%s952_s3] ss:$0 sm:$0xff] }
  0xdc   :  { %vm279_vm6 = vcmp.eq.s32.totalorder %v274_v2, 2  ;;  %vm276_vm7 = vcmp.eq.s32.totalorder %v274_v2, 0  ;;  %vm275_vm8 = vcmp.lt.s32.totalorder %v274_v2, 2  ;;  %616 = vmatpush3.bf16.msra.mxu1 %v662_v18 }
  0xdd   :  { %v153_v29 = vor.u32 %v152_v26, %v151_v24  ;;  %v156_v30 = vshll.u32 %v155_v27, 23  ;;  %v249_v31 = vclz %v544_v28  ;;  %617 = vmatprep.subr.bf16.mxu1 %v749_v4 }
  0xdf   :  { %v157_v33 = vor.u32 4788187, %v156_v30  ;;  %v545_v34 = vadd.s32 4294967294, %v249_v31  ;;  %v160_v36 = vcvt.s32.f32 %v153_v29 }
  0xe0   :  { %618 = vmatpush3.bf16.msra.mxu1 %v663_v19 }
  0xe1   :  { %v158_v35 = vand.u32 2147483647, %v157_v33  ;;  %vm546_vm14 = vcmp.lt.s32.totalorder %v545_v34, 0 }
  0xe2   :  { %v252_v40 = vsel %vm546_vm14, 0, %v545_v34  ;;  %v556_v34 = vld [vmem:[%s955_s6] ss:$0 sm:$0xff] }
  0xe3   :  { %v161_v38 = vmul.f32 %v160_v36, %v158_v35  ;;  %v253_v16 = vsub.s32 32, %v252_v40  ;;  %v257_v17 = vsub.s32 4294967266, %v252_v40  ;;  %v254_v37 = vshll.u32 %v245_v15, %v252_v40 }
  0xe5   :  { %v162_v42 = vxor.u32 2147483648, %v161_v38  ;;  %v255_v44 = vshrl.u32 %v237_v41, %v253_v16  ;;  %v258_v43 = vadd.s32 127, %v257_v17 }
  0xe7   :  { %v163_v45 = vsel %vm80_vm15, %v162_v42, %v161_v38  ;;  %v256_v47 = vor.u32 %v255_v44, %v254_v37  ;;  %v259_v48 = vshll.u32 %v258_v43, 23 }
  0xe8   :  { %v166_v50 = vsel %vm908_vm0, %v850_v20, %v163_v45  ;;  %v400_v20 = vstv %s953_s4  ;;  %s525_s4 = sshll.u32 %s757_s11, 4  ;;  %s526_s4 = int_to_ptr.vmem [resolvable:$true] %s525_s4 }
  0xe9   :  { %v260_v51 = vor.u32 4788187, %v259_v48  ;;  %664 = vcosq.f32 %v166_v50  ;;  %v263_v49 = vcvt.s32.f32 %v256_v47  ;;  %s716_s12 = scalar_lea.vmem %s526_s4, 256  ;;  %p721_p3 = scmp.lt.s32.totalorder %s526_s4, %s526_s4 }
  0xea   :  { %666 = vsinq.f32 %v166_v50  ;;  %p717_p2 = scmp.ne.s32.totalorder %s526_s4, %s716_s12  ;;  %p722_p4 = scmp.lt.s32.totalorder %s716_s12, %s716_s12 }
  0xeb   :  { %v261_v52 = vand.u32 2147483647, %v260_v51 }
  0xec   :  { %p723_p5 = por %p722_p4, %p721_p3 }
  0xed   :  { %v264_v53 = vmul.f32 %v263_v49, %v261_v52 }
  0xee   :  { %p724_p6 = pnand %p723_p5, %p717_p2 }
  0xef   :  { %v265_v55 = vxor.u32 2147483648, %v264_v53 }
  0xf1   :  { %v266_v21 = vsel %vm183_vm1, %v265_v55, %v264_v53 }
  0xf2   :  { %v269_v57 = vsel %vm182_vm2, %v854_v25, %v266_v21 }
  0xf3   :  { %668 = vcosq.f32 %v269_v57  ;;  %v665_v60 = vpop.eup %664 }
  0xf4   :  { %670 = vsinq.f32 %v269_v57  ;;  %v667_v63 = vpop.eup %666  ;;  %v177_v32 = vxor.u32 2147483648, %v665_v60 }
  0xf5   :  { %v174_v1 = vxor.u32 2147483648, %v667_v63 }
  0xf6   :  { %v178_v6 = vsel %vm176_vm4, %v177_v32, %v667_v63 }
  0xf7   :  { %v175_v5 = vsel %vm173_vm3, %v665_v60, %v174_v1 }
  0xf8   :  { %v179_v9 = vsel %vm172_vm5, %v175_v5, %v178_v6 }
  0xf9   :  { %v180_v13 = vsel %vm170_vm9, nan, %v179_v9 }
  0xfd   :  { %v669_v3 = vpop.eup %668 }
  0xfe   :  { %v671_v7 = vpop.eup %670  ;;  %v280_v58 = vxor.u32 2147483648, %v669_v3 }
  0xff   :  { %v277_v8 = vxor.u32 2147483648, %v671_v7 }
 0x100   :  { %v281_v10 = vsel %vm279_vm6, %v280_v58, %v671_v7 }
 0x101   :  { %v278_v11 = vsel %vm276_vm7, %v669_v3, %v277_v8 }
 0x102   :  { %v282_v12 = vsel %vm275_vm8, %v278_v11, %v281_v10 }
 0x103   :  { %v283_v14 = vsel %vm273_vm10, nan, %v282_v12 }
 0x104   :  { %v284_v15 = vpack.c.bf16 %v283_v14, %v180_v13 }
 0x106   :  { %600 = vmatmul.mubr.bf16.vlgmr.msra.gmra.mrb[0].mxu0 %v284_v15 }
 0x1d9   :  { %v390_v23 = vpop.f32.mrb[0].mxu0 }
 0x1da   :  { %v391_v25 = vadd.f32 %v547_v22, %v390_v23  ;;  %v601_v24 = vpop.f32.mrb[1].mxu0 }
 0x1db   :  { %v393_v26 = vpop.f32.mrb[2].mxu0 }
 0x1dc   :  { %v401_v27 = vmul.f32 %v400_v20, %v391_v25  ;;  %v394_v28 = vadd.f32 %v547_v22, %v393_v26  ;;  %v602_v29 = vpop.f32.mrb[3].mxu0  ;;  %vm398_vm11 = vcmp.ge.f32.partialorder %v391_v25, 0.0 }
 0x1de   :  { %vm399_vm12 = vcmp.ge.f32.partialorder %v394_v28, 0.0  ;;  %v402_v30 = vmul.f32 %v400_v20, %v394_v28  ;;  %v403_v4 = vsel %vm398_vm11, %v391_v25, %v401_v27 }
 0x1e0   :  { %v404_v31 = vsel %vm399_vm12, %v394_v28, %v402_v30 }
 0x1e1   :  { %v405_v33 = vpack.c.bf16 %v404_v31, %v403_v4 }
 0x1e3   :  { %620 = vmatmul.mubr.bf16.vlgmr.msra.gmra.mrb[0].mxu1 %v405_v33 }
 0x2b6   :  { %v511_v35 = vpop.f32.mrb[0].mxu1 }
 0x2b7   :  { %v512_v36 = vadd.f32 %v556_v34, %v511_v35  ;;  %v621_v38 = vpop.f32.mrb[1].mxu1 }
 0x2b8   :  { %v514_v40 = vpop.f32.mrb[2].mxu1 }
 0x2b9   :  { %518 = vst [vmem:[#allocation8] sm:$0xff] %v512_v36  ;;  %v515_v41 = vadd.f32 %v556_v34, %v514_v40  ;;  %v622_v16 = vpop.f32.mrb[3].mxu1 }
 0x2bb   :  { %519 = vst [vmem:[#allocation8 + $0x8] sm:$0xff] %v515_v41 }
 0x2bc   :  { %727 = shalt.err (!%p724_p6)
}
 0x2bd   :  { %s728_s14 = scalar_lea.hbm %s956_s7, 256 }
 0x2be   :  { %p729_p7 = scmp.ne.s32.totalorder %s956_s7, %s728_s14  ;;  %p732_p8 = scmp.lt.u32.totalorder %s728_s14, %s956_s7 }
 0x2c0   :  { %p734_p9 = pnand %p732_p8, %p729_p7 }
 0x2c2   :  { %737 = shalt.err (!%p734_p9)
}
 0x2c3   :  { %s758_s19 = smov 128   ;;  %s759_s20 = smov 8  }
 0x2c4   :  { %531 = dma.vmem_to_hbm [thread:$0]  %s526_s4, 256, %s956_s7, [#allocation5], %s758_s19, %s758_s19, %s759_s20  }
 0x2c5   :  { %742 = dma.done.wait [#allocation5], 256  }
 0x2c6   :  { %743 = vsyncadd [#allocation5], 4294967040 }
 0x2c7   :  { %535 = vsyncpa [#allocation4], 1 }
 0x2c8   :  { %536 = vsyncpa [#allocation7], 1 }
 0x2c9   :  { %537 = vsyncpa [#allocation5], 1 }

</bundles_post_ra>
